<compile_context>
chip_gen: v5e
topology: v5e:2x2
jax: 0.10.0
libtpu: 0.0.40
codegen_flags: <defaults>
</compile_context>

<pallas_src>
import functools
import math

import jax
import jax.numpy as jnp
from jax.experimental import pallas as pl
from jax.experimental.pallas import tpu as pltpu


def _rmsnorm_kernel(w_ref, x_ref, o_ref, *, eps, root_dim):
    # x_ref: (TR, D) row-block; w_ref: (1, D) VMEM-resident weight tile.
    xf = x_ref[...].astype(jnp.float32)
    ssq = jnp.sum(xf * xf, axis=-1, keepdims=True)           # (TR, 1) f32
    norm = jnp.sqrt(ssq)                                      # L2 norm per row
    scale = root_dim / jnp.maximum(norm, eps)                 # F.normalize clamp_min(eps)
    o_ref[...] = (xf * (scale * w_ref[...])).astype(o_ref.dtype)


def _choose_block_rows(R, D, itemsize, *, target_bytes=2 << 20, min_steps=8):
    """Rows per block: multiple of 8 (TPU sublane rule), sized so the
    native-dtype block is ~target_bytes, and capped so the grid has at least
    ~min_steps steps when R allows it (keeps the DMA pipeline full and lets
    v7x's two TensorCores split the 'parallel' axis)."""
    if R <= 8:
        return R  # full extent is always layout-legal
    budget_rows = max(8, (target_bytes // (itemsize * D)) // 8 * 8)
    steps_rows = max(8, pl.cdiv(R, min_steps) // 8 * 8)
    return int(min(budget_rows, steps_rows))


def rmsnorm_pallas(x, weight, eps=1e-6):
    """x: (..., D), weight: (D,). Mirrors RMSNorm.forward from the PyTorch spec."""
    orig_shape = x.shape
    D = int(orig_shape[-1])
    assert weight.shape == (D,)
    R = 1
    for s in orig_shape[:-1]:
        R *= int(s)

    x2 = x.reshape(R, D)
    w2 = weight.reshape(1, D).astype(jnp.float32)
    root_dim = math.sqrt(D)

    itemsize = jnp.dtype(x.dtype).itemsize
    tr = _choose_block_rows(R, D, itemsize)
    grid = (pl.cdiv(R, tr),)  # ragged last block is padded/masked by Pallas

    kernel = functools.partial(
        _rmsnorm_kernel, eps=float(eps), root_dim=float(root_dim)
    )

    out = pl.pallas_call(
        kernel,
        out_shape=jax.ShapeDtypeStruct((R, D), x.dtype),
        grid_spec=pltpu.PrefetchScalarGridSpec(
            num_scalar_prefetch=0,
            grid=grid,
            in_specs=[
                pl.BlockSpec((1, D), lambda i: (0, 0)),    # weight: VMEM-resident
                pl.BlockSpec((tr, D), lambda i: (i, 0)),   # x row-block
            ],
            out_specs=pl.BlockSpec((tr, D), lambda i: (i, 0)),
        ),
        compiler_params=pltpu.CompilerParams(
            dimension_semantics=("parallel",),
            vmem_limit_bytes=32 << 20,
        ),
    )(w2, x2)

    return out.reshape(orig_shape)


def rmsnorm_reference(x, weight, eps=1e-6):
    """Pure-JAX mirror of the PyTorch forward, for correctness checking."""
    D = x.shape[-1]
    xf = x.astype(jnp.float32)
    norm = jnp.sqrt(jnp.sum(xf * xf, axis=-1, keepdims=True))
    out = xf / jnp.maximum(norm, eps) * math.sqrt(D) * weight.astype(jnp.float32)
    return out.astype(x.dtype)


if __name__ == "__main__":
    eps = 1e-6
    dim_size = 128  # last dim = normalized dim; 128 keeps stores lane-dense

    key = jax.random.PRNGKey(0)
    kw, k1, k2 = jax.random.split(key, 3)
    # Module initializes weight to ones; use a non-trivial deterministic weight
    # so the weight multiply is actually exercised.
    weight = 1.0 + 0.1 * jax.random.normal(kw, (dim_size,), dtype=jnp.float32)

    # Case 1: small (batch=2, seq=8, hidden=128) -> R=16 -> 2 pipelined steps.
    x_small = jax.random.normal(k1, (2, 8, dim_size), dtype=jnp.float32)
    # Case 2: R=150 (not a multiple of the row block) -> exercises the
    # cdiv-grid padded/masked last block and a ~10-step pipeline.
    x_ragged = jax.random.normal(k2, (3, 50, dim_size), dtype=jnp.float32)

    ok = True
    for x in (x_small, x_ragged):
        out = jax.block_until_ready(rmsnorm_pallas(x, weight, eps=eps))
        ref = rmsnorm_reference(x, weight, eps=eps)
        ok = ok and (out.shape == x.shape) and (out.dtype == x.dtype)
        ok = ok and bool(jnp.allclose(out, ref, atol=1e-5, rtol=1e-5))
    assert ok

    print("KERNEL_OK")
</pallas_src>

<mosaic_0001>
module attributes {stable_mosaic.version = 11 : i64} {
  func.func @_rmsnorm_kernel(%arg0: i32, %arg1: memref<1x128xf32, #tpu.memory_space<vmem>>, %arg2: memref<8x128xf32, #tpu.memory_space<vmem>>, %arg3: memref<8x128xf32, #tpu.memory_space<vmem>>) attributes {dimension_semantics = [#tpu.dimension_semantics<parallel>], iteration_bounds = array<i64: 2>, scalar_prefetch = 0 : i64, scratch_operands = 0 : i64, tpu.core_type = #tpu.core_type<tc>, window_params = [{pipeline_mode = #tpu.pipeline_mode<synchronous>, transform_indices = @transform_0, window_bounds = array<i64: 1, 128>}, {transform_indices = @transform_1, window_bounds = array<i64: 8, 128>}, {transform_indices = @transform_2, window_bounds = array<i64: 8, 128>}]} {
    %c0 = arith.constant 0 : index
    %c0_0 = arith.constant 0 : index
    %0 = vector.load %arg2[%c0, %c0_0] : memref<8x128xf32, #tpu.memory_space<vmem>>, vector<8x128xf32>
    %1 = arith.mulf %0, %0 : vector<8x128xf32>
    %cst = arith.constant dense<0.000000e+00> : vector<8xf32>
    %2 = vector.multi_reduction <add>, %1, %cst [1] : vector<8x128xf32> to vector<8xf32>
    %3 = vector.shape_cast %2 : vector<8xf32> to vector<8x1xf32>
    %4 = math.sqrt %3 : vector<8x1xf32>
    %cst_1 = arith.constant 9.99999997E-7 : f32
    %5 = vector.broadcast %cst_1 : f32 to vector<8x1xf32>
    %6 = arith.maximumf %4, %5 : vector<8x1xf32>
    %cst_2 = arith.constant 11.3137083 : f32
    %7 = vector.broadcast %cst_2 : f32 to vector<8x1xf32>
    %8 = arith.divf %7, %6 : vector<8x1xf32>
    %c0_3 = arith.constant 0 : index
    %c0_4 = arith.constant 0 : index
    %9 = vector.load %arg1[%c0_3, %c0_4] : memref<1x128xf32, #tpu.memory_space<vmem>>, vector<1x128xf32>
    %10 = vector.broadcast %8 : vector<8x1xf32> to vector<8x128xf32>
    %11 = vector.broadcast %9 : vector<1x128xf32> to vector<8x128xf32>
    %12 = arith.mulf %10, %11 : vector<8x128xf32>
    %13 = arith.mulf %0, %12 : vector<8x128xf32>
    %c0_5 = arith.constant 0 : index
    %c0_6 = arith.constant 0 : index
    %14 = vector.load %arg3[%c0_5, %c0_6] : memref<8x128xf32, #tpu.memory_space<vmem>>, vector<8x128xf32>
    tpu.vector_store %arg3[%c0_5, %c0_6], %13 {strides = array<i32>} : memref<8x128xf32, #tpu.memory_space<vmem>>, vector<8x128xf32>,
    return
  }
  func.func @transform_0(%arg0: i32) -> (i32, i32) {
    %c0_i32 = arith.constant 0 : i32
    %c0_i32_0 = arith.constant 0 : i32
    %c0_i32_1 = arith.constant 0 : i32
    return %c0_i32, %c0_i32_0 : i32, i32
  }
  func.func @transform_1(%arg0: i32) -> (i32, i32) {
    %c0_i32 = arith.constant 0 : i32
    %c0_i32_0 = arith.constant 0 : i32
    return %arg0, %c0_i32 : i32, i32
  }
  func.func @transform_2(%arg0: i32) -> (i32, i32) {
    %c0_i32 = arith.constant 0 : i32
    %c0_i32_0 = arith.constant 0 : i32
    return %arg0, %c0_i32 : i32, i32
  }
}

</mosaic_0001>

<bundles_post_ra>
// kernel: tpu_custom_call.1
= control target key start
LH: loop header
LB: loop body
LE: loop exit
PB: predicated region body
PF: predicated region fallthrough
CT: control target
= control target key end

     0   :  { %7 = vsyncpa [#allocation3], 0  ;;  %s679_s0 = inlined_call_operand.hbm [shape: f32[1,128], index: 0, kind: input, shape index: {}]   ;;  %s680_s1 = inlined_call_operand.hbm [shape: f32[16,128], index: 1, kind: input, shape index: {}]   ;;  %s681_s2 = inlined_call_operand.hbm [shape: f32[16,128], index: 2, kind: output, shape index: {}]  }
   0x1   :  { %8 = vsyncpa [#allocation6], 0 }
   0x2   :  { %10 = vsyncpa [#allocation6 + $0x1], 0 }
   0x3   :  { %11 = vsyncpa [#allocation4], 0 }
   0x4   :  { %13 = vsyncpa [#allocation4 + $0x1], 0  ;;  %s537_s9 = smov 0   ;;  %s539_s10 = smov 0  }
   0x5   :  { %s541_s11 = smov 0   ;;  %s543_s12 = smov 0  }
   0x6 LB: > { %s558_s13 = sadd.s32 4294967295, %s519_s12   ;;  %s313_s14 = sadd.s32 4294967294, %s519_s12   ;;  %s519_s12 = sphi %s543_s12, %s691_s12   ;;  %s515_s11 = sphi %s541_s11, %s690_s11   ;;  %s511_s10 = sphi %s539_s10, %s689_s10   ;;  %s507_s9 = sphi %s537_s9, %s688_s9  }
   0x7   : > { %p60_p0 = scmp.ne.s32.totalorder %s511_s10, %s507_s9  ;;  %p61_p1 = scmp.eq.s32.totalorder %s558_s13, 0 }
   0x8   : > { %p84_p2 = scmp.eq.s32.totalorder %s558_s13, 1  ;;  %p90_p3 = scmp.eq.s32.totalorder %s313_s14, 1 }
   0x9   : > { %p567_p4 = por %p61_p1, %p60_p0  ;;  %p314_p5 = scmp.ge.s32.totalorder %s519_s12, 1 }
   0xa   : > { %p572_p6 = por %p90_p3, %p60_p0  ;;  %p97_p7 = scmp.lt.s32.totalorder %s519_s12, 3 }
   0xb   : > { %s109_s19 = sshll.u32 %s679_s0, 4  ;;  %s521_s21 = smov [#allocation2]   ;;  %s110_s19 = int_to_ptr.hbm [resolvable:$true] %s109_s19 }
   0xc   : > { %p580_p8 = pnand %p314_p5, %p97_p7  ;;  %s111_s22 = sshll.u32 %s521_s21, 4  ;;  %s112_s22 = int_to_ptr.vmem [resolvable:$true] %s111_s22 }
   0xd   : > { %s590_s23 = sadd.s32 1, %s519_s12   ;;  %s47_s24 = sadd.s32 1, %s515_s11 }
   0xe   : > { %p335_p10 = pneg %p580_p8  ;;  %s44_s25 = ssub.s32 %s519_s12, %s590_s23 }
   0xf   : > { %p45_p12 = scmp.eq.s32.totalorder %s44_s25, 0  ;;  %p54_p13 = scmp.ne.s32.totalorder %s515_s11, %s511_s10 }
  0x10   : > { %p336_p11 = pnand %p335_p10, %p61_p1  ;;  %p55_p0 = scmp.eq.s32.totalorder %s519_s12, 0 }
  0x11   : > { %s599_s26 = scalar_select %p45_p12, %s515_s11, %s47_s24  }
  0x12   : > { %338 = dma.hbm_to_vmem [thread:$0]  (!%p336_p11), %s110_s19, 16, %s112_s22, [#allocation3]  }
  0x13   : > { %p603_p3 = por %p84_p2, %p54_p13  ;;  %p348_p5 = scmp.lt.s32.totalorder %s519_s12, 2 }
  0x14   : > { %s122_s28 = sand.u32 1, %s515_s11   ;;  %s318_s29 = sshll.u32 %s519_s12, 3 }
  0x15   : > { %p56_p7 = por %p55_p0, %p54_p13  ;;  %s317_s30 = sshll.u32 %s122_s28, 3 }
  0x16   : > { %s130_s5 = scalar_lea.hbm %s680_s1, %s318_s29  ;;  %s126_s7 = scalar_lea.vmem [#allocation5], %s317_s30 }
  0x17   : > { %s132_s6 = sshll.u32 %s130_s5, 4  ;;  %s134_s8 = sshll.u32 %s126_s7, 4  ;;  %s133_s6 = int_to_ptr.hbm [resolvable:$true] %s132_s6  ;;  %s135_s8 = int_to_ptr.vmem [resolvable:$true] %s134_s8 }
  0x18   : > { %p613_p10 = pnand %p348_p5, %p56_p7  ;;  %s123_s17 = scalar_lea.sflag [#allocation6], %s122_s28 }
  0x19   : > { %s419_s18 = sshra.s32 %s133_s6, 4  ;;  %s426_s24 = scalar_lea.hbm %s680_s1, 16  ;;  %s420_s18 = int_to_ptr.hbm [resolvable:$true] %s419_s18 }
  0x1a   : > { %s421_s19 = scalar_lea.hbm %s420_s18, 8  ;;  %p423_p11 = pneg %p613_p10 }
  0x1b   : > { %p422_p2 = scmp.ne.s32.totalorder %s420_s18, %s421_s19  ;;  %p427_p0 = scmp.lt.s32.totalorder %s420_s18, %s680_s1 }
  0x1c   : > { %p428_p5 = scmp.lt.s32.totalorder %s426_s24, %s421_s19 }
  0x1d   : > { %p424_p12 = pnand %p423_p11, %p422_p2 }
  0x1e   : > { %p429_p7 = por %p428_p5, %p427_p0 }
  0x1f   : > { %p425_p13 = pneg %p424_p12 }
  0x21   : > { %p430_p9 = pnand %p429_p7, %p425_p13 }
  0x23   : > { %433 = shalt.err (!%p430_p9)
}
  0x24   : > { %342 = dma.hbm_to_vmem [thread:$0]  (!%p613_p10), %s133_s6, 128, %s135_s8, %s123_s17  }
  0x25   : > { %143 = sbr.rel (%p580_p8) target bundleno = 215 (0xd7), region = 28 }
  0x2a   : > { %494 = dma.done.wait (%p61_p1), [#allocation3], 16  }
  0x2b   : > { %496 = vsyncadd (%p61_p1), [#allocation3], 4294967280  ;;  %s634_s28 = sand.u32 1, %s511_s10  }
  0x2c   : > { %s321_s30 = sshll.u32 %s634_s28, 3  ;;  %s151_s3 = scalar_lea.sflag [#allocation6], %s634_s28 }
  0x2d   : > { %s154_s4 = scalar_lea.vmem [#allocation5], %s321_s30 }
  0x2e   : > { %498 = dma.done.wait (%p567_p4), %s151_s3, 128  }
  0x2f   : > { %500 = vsyncadd (%p567_p4), %s151_s3, 4294967168  ;;  %v176_v0 = vld [vmem:[%s154_s4] sm:$0xff]  ;;  %s324_s15 = sshll.u32 %s558_s13, 3  ;;  %v384_v23 = vld [vmem:[#allocation2] ss:$0 sm:$0xff]  ;;  %s175_s7 = scalar_lea.vmem [#allocation7], %s321_s30 }
  0x30   : > { %v177_v1 = vmul.f32 %v176_v0, %v176_v0  ;;  %s226_s6 = scalar_lea.hbm %s681_s2, %s324_s15  ;;  %s228_s8 = sshll.u32 %s175_s7, 4  ;;  %s229_s8 = int_to_ptr.vmem [resolvable:$true] %s228_s8 }
  0x31   : > { %s230_s14 = sshll.u32 %s226_s6, 4  ;;  %s216_s13 = scalar_lea.sflag [#allocation4], %s634_s28  ;;  %s231_s14 = int_to_ptr.hbm [resolvable:$true] %s230_s14 }
  0x32   : > { %178 = vadd.xlane.f32.xlu0 %v177_v1  ;;  %s463_s17 = sshra.s32 %s231_s14, 4  ;;  %s469_s22 = scalar_lea.hbm %s681_s2, 16  ;;  %s464_s17 = int_to_ptr.hbm [resolvable:$true] %s463_s17 }
  0x33   : > { %s465_s18 = scalar_lea.hbm %s464_s17, 8  ;;  %p470_p9 = scmp.lt.s32.totalorder %s464_s17, %s681_s2 }
  0x34   : > { %p466_p1 = scmp.ne.s32.totalorder %s464_s17, %s465_s18  ;;  %p471_p10 = scmp.lt.s32.totalorder %s469_s22, %s465_s18 }
  0x36   : > { %p467_p4 = pnand %p466_p1, %p603_p3  ;;  %p472_p2 = por %p471_p10, %p470_p9 }
  0x38   : > { %p468_p8 = pneg %p467_p4 }
  0x3a   : > { %p473_p11 = pnand %p472_p2, %p468_p8 }
  0xa5   : > { %v179_v2 = vpop.xlane.xlu0 %178 }
  0xa6   : > { %385 = vrsqrt.f32 %v179_v2  ;;  %vm187_vm0 = vcmp.eq.f32.partialorder %v179_v2, inf  ;;  %v190_v10 = vand.u32 2147483648, %v179_v2  ;;  %vm189_vm1 = vcmp.eq.f32.partialorder %v179_v2, 0.0 }
  0xac   : > { %v386_v3 = vpop.eup %385 }
  0xad   : > { %v181_v4 = vmul.f32 %v386_v3, %v179_v2 }
  0xaf   : > { %v182_v5 = vmul.f32 %v386_v3, %v181_v4 }
  0xb1   : > { %v183_v6 = vmul.f32 0.5, %v182_v5 }
  0xb3   : > { %v184_v7 = vsub.f32 1.5, %v183_v6 }
  0xb5   : > { %v185_v8 = vmul.f32 %v386_v3, %v184_v7 }
  0xb7   : > { %v186_v9 = vmul.f32 %v185_v8, %v179_v2 }
  0xb9   : > { %v188_v11 = vsel %vm187_vm0, %v179_v2, %v186_v9 }
  0xba   : > { %v191_v12 = vsel %vm189_vm1, %v190_v10, %v188_v11 }
  0xbb   : > { %v192_v13 = vmax.f32 %v191_v12, 1e-06 }
  0xbd   : > { %387 = vrcp.f32 %v192_v13  ;;  %v204_v17 = vand.u32 2147483648, %v192_v13  ;;  %v202_v19 = vand.u32 2147483647, %v192_v13  ;;  %vm198_vm3 = vweird.f32 %v192_v13 }
  0xbf   : > { %v205_v21 = vor.u32 1.1754944e-38, %v204_v17  ;;  %vm203_vm5 = vcmp.eq.f32.partialorder %v202_v19, 8.507059e+37 }
  0xc3   : > { %v388_v14 = vpop.eup %387 }
  0xc4   : > { %v194_v15 = vmul.f32 %v388_v14, %v192_v13  ;;  %vm199_vm2 = vweird.f32 %v388_v14 }
  0xc5   : > { %vm200_vm4 = vmor %vm198_vm3, %vm199_vm2 }
  0xc6   : > { %v195_v16 = vsub.f32 1.0, %v194_v15 }
  0xc8   : > { %v196_v18 = vmul.f32 %v388_v14, %v195_v16 }
  0xca   : > { %v197_v20 = vadd.f32 %v388_v14, %v196_v18 }
  0xcc   : > { %v201_v22 = vsel %vm200_vm4, %v388_v14, %v197_v20 }
  0xcd   : > { %v206_v24 = vsel %vm203_vm5, %v205_v21, %v201_v22 }
  0xce   : > { %v207_v25 = vmul.f32 11.313708, %v206_v24 }
  0xd0   : > { %v212_v26 = vmul.f32 %v384_v23, %v207_v25 }
  0xd2   : > { %v213_v27 = vmul.f32 %v212_v26, %v176_v0 }
  0xd4   : > { %214 = vst [vmem:[%s175_s7] sm:$0xff] %v213_v27 }
  0xd5   : > { %476 = shalt.err (!%p473_p11)
}
  0xd6   : > { %333 = dma.vmem_to_hbm [thread:$0]  (%p603_p3), %s229_s8, 128, %s231_s14, %s216_s13  }
  0xd7 PF: > { %s242_s29 = sand.u32 1, %s507_s9   ;;  %p687_p12 = scmp.ge.s32.totalorder %s519_s12, 2 }
  0xd8   : > { %s243_s28 = scalar_lea.sflag [#allocation4], %s242_s29 }
  0xd9   : > { %p344_p13 = pnand %p687_p12, %p572_p6 }
  0xdb   : > { %p345_p0 = pneg %p344_p13 }
  0xdd   : > { %502 = dma.done.wait (%p345_p0), %s243_s28, 128  }
  0xde   : > { %504 = vsyncadd (%p345_p0), %s243_s28, 4294967168  ;;  %p16_p5 = scmp.ge.s32.totalorder %s590_s23, 4   ;;  %s688_s9 = smov %s511_s10 }
  0xdf   : > { %s689_s10 = smov %s515_s11  ;;  %s690_s11 = smov %s599_s26 }
  0xe0   : > { %s691_s12 = smov %s590_s23  ;;  %18 = sbr.rel (!%p16_p5) target bundleno = 6 (0x6), region = 78 }
  0xe5   :  { %249 = vsyncpa [#allocation3], 1 }
  0xe6   :  { %251 = vsyncpa [#allocation3 + $0x1], 1 }
  0xe7   :  { %252 = vsyncpa [#allocation6], 1 }
  0xe8   :  { %254 = vsyncpa [#allocation6 + $0x1], 1 }
  0xe9   :  { %255 = vsyncpa [#allocation4], 1 }
  0xea   :  { %257 = vsyncpa [#allocation4 + $0x1], 1 }

</bundles_post_ra>
